<compile_context>
chip_gen: v5e
topology: v5e:2x2
jax: 0.10.0
libtpu: 0.0.40
codegen_flags: <defaults>
</compile_context>

<pallas_src>
import jax
import jax.numpy as jnp
from jax.experimental import pallas as pl
from jax.experimental.pallas import tpu as pltpu


def _fc_cls_kernel(a_ref, t_ref, w_ref, b_ref, out_ref):
    # a_ref / t_ref : [tb, H]      CLS features (anchor / target)
    # w_ref         : [2H, Tp]     fc weight, pre-transposed + lane-padded
    # b_ref         : [1, Tp]      fc bias (f32), lane-padded
    # out_ref       : [tb, Tp]
    H = a_ref.shape[1]
    # cat([cls_a, cls_t], 1) @ W.T  ==  cls_a @ W[:, :H].T + cls_t @ W[:, H:].T
    acc = jnp.dot(a_ref[...], w_ref[:H, :], preferred_element_type=jnp.float32)
    acc = acc + jnp.dot(t_ref[...], w_ref[H:, :],
                        preferred_element_type=jnp.float32)
    out_ref[...] = (acc + b_ref[...]).astype(out_ref.dtype)


def prepare_fc_params(fc_weight, fc_bias, *, compute_dtype=jnp.bfloat16):
    """One-time (model-init) prep of fc params.

    fc_weight: [T, 2H] (PyTorch nn.Linear layout), fc_bias: [T]
    Returns (w [2H, Tp] in compute_dtype, b [1, Tp] f32, T). Tp = roundup(T,128)
    so the kernel's output stores are lane-dense/unmasked.
    """
    T = fc_weight.shape[0]
    Tp = 128 * pl.cdiv(max(T, 1), 128)
    w = fc_weight.T                                     # [2H, T], single transpose
    if Tp != T:
        w = jnp.pad(w, ((0, 0), (0, Tp - T)))
        b = jnp.pad(fc_bias, (0, Tp - T))
    else:
        b = fc_bias
    if compute_dtype is not None:
        w = w.astype(compute_dtype)
    b = b.astype(jnp.float32).reshape(1, Tp)            # bias add stays f32
    return w, b, T


def custom_model_forward(anchor_hidden, target_hidden, w_prepared, b_prepared,
                         target_size, *, compute_dtype=jnp.bfloat16,
                         block_b=256, out_dtype=None, unpad=True):
    """anchor_hidden, target_hidden: [B, S, H] backbone last_hidden_states.
       w_prepared, b_prepared: from prepare_fc_params (done once, not per call).
       compute_dtype: dtype fed to the MXU for the CLS operands (accumulation
         and bias add stay f32). Default bf16 (supported on v5e/v6e/v7x MXU).
       unpad=False returns the lane-padded [B, Tp] slab (skips the tiny
         post-kernel slice copy when T << 128)."""
    B, S, H = anchor_hidden.shape
    H2, Tp = w_prepared.shape
    assert H2 == 2 * H, (H2, H)
    out_dtype = anchor_hidden.dtype if out_dtype is None else out_dtype

    # Only the CLS row is needed. The slice (and bf16 cast) stays here but is
    # fused into the pallas_call operands via allow_input_fusion, so the full
    # [B, S, H] tensors are never copied and no extra kernel launch occurs.
    cls_a = anchor_hidden[:, 0, :]                      # [B, H]
    cls_t = target_hidden[:, 0, :]                      # [B, H]
    if compute_dtype is not None:
        cls_a = cls_a.astype(compute_dtype)
        cls_t = cls_t.astype(compute_dtype)

    # Batch tile: >=2 grid steps when B is large so v7x's two TensorCores both
    # get work ("parallel" axis); as few and as fat as possible otherwise
    # (grid steps are a serial loop on single-TC v5e/v6e, ~0.35us each).
    if B <= 8:
        tb = B
    else:
        half = pl.cdiv(B, 2)
        tb = min(block_b, 8 * pl.cdiv(half, 8))
    grid = (pl.cdiv(B, tb),)

    # Raise the scoped-VMEM limit only when the (double-buffered) footprint
    # might exceed the conservative default (16 MiB on v5e, 32 MiB v6e/v7x).
    in_itemsize = jnp.dtype(compute_dtype
                            if compute_dtype is not None
                            else anchor_hidden.dtype).itemsize
    est_vmem = (2 * 2 * tb * H * in_itemsize            # cls_a + cls_t tiles
                + 2 * (2 * H) * Tp * in_itemsize        # resident weight
                + 2 * Tp * 4                            # resident bias (f32)
                + 2 * tb * Tp * jnp.dtype(out_dtype).itemsize)
    cp_kwargs = {}
    if est_vmem > 12 * (1 << 20):
        # Cap below v7x's 64 MiB physical VMEM per TensorCore.
        cp_kwargs["vmem_limit_bytes"] = int(min(2 * est_vmem, 56 * (1 << 20)))
    # TODO(synk): for very large T, additionally single-buffer the resident
    # weight/bias (pipeline_mode=pl.Buffered(1)) to halve their VMEM footprint.

    out_padded = pl.pallas_call(
        _fc_cls_kernel,
        out_shape=jax.ShapeDtypeStruct((B, Tp), out_dtype),
        grid=grid,
        in_specs=[
            pl.BlockSpec((tb, H), lambda i: (i, 0)),        # cls_a tile
            pl.BlockSpec((tb, H), lambda i: (i, 0)),        # cls_t tile
            pl.BlockSpec((2 * H, Tp), lambda i: (0, 0)),    # weight (resident)
            pl.BlockSpec((1, Tp), lambda i: (0, 0)),        # bias   (resident)
        ],
        out_specs=pl.BlockSpec((tb, Tp), lambda i: (i, 0)),
        compiler_params=pltpu.CompilerParams(
            dimension_semantics=("parallel",),
            allow_input_fusion=[True, True, True, True],
            **cp_kwargs),
    )(cls_a, cls_t, w_prepared, b_prepared)

    if unpad and target_size != Tp:
        return out_padded[:, :target_size]
    return out_padded


def reference_forward(anchor_hidden, target_hidden, fc_weight, fc_bias):
    cls_a = anchor_hidden[:, 0, :]
    cls_t = target_hidden[:, 0, :]
    feat = jnp.concatenate([cls_a, cls_t], axis=1)
    return feat @ fc_weight.T + fc_bias


if __name__ == "__main__":
    # Small shapes consistent with the module's forward:
    B, S, H, T = 2, 8, 32, 1          # batch, seq, hidden_size, target_size
    INIT_RANGE = 0.02                 # config.initializer_range

    key = jax.random.PRNGKey(0)
    k1, k2, k3 = jax.random.split(key, 3)

    # Stand-ins for the two backbones' last_hidden_states.
    anchor_hidden = jax.random.normal(k1, (B, S, H), dtype=jnp.float32)
    target_hidden = jax.random.normal(k2, (B, S, H), dtype=jnp.float32)

    # fc: Linear(hidden_size * 2, target_size), weight ~ N(0, init_range), bias = 0
    fc_weight = INIT_RANGE * jax.random.normal(k3, (T, 2 * H), dtype=jnp.float32)
    fc_bias = jnp.zeros((T,), dtype=jnp.float32)

    ref = reference_forward(anchor_hidden, target_hidden, fc_weight, fc_bias)

    # f32 path (exact-tolerance check).
    w32, b32, _ = prepare_fc_params(fc_weight, fc_bias, compute_dtype=None)
    fwd_f32 = jax.jit(lambda a, t, w, b: custom_model_forward(
        a, t, w, b, T, compute_dtype=None))
    out = jax.block_until_ready(fwd_f32(anchor_hidden, target_hidden, w32, b32))
    assert out.shape == (B, T), out.shape
    assert jnp.allclose(out, ref, atol=1e-5, rtol=1e-5), (out, ref)

    # Default path: bf16-fed MXU (f32 accumulation), params prepared once.
    wbf, bbf, _ = prepare_fc_params(fc_weight, fc_bias)   # bf16 by default
    fwd = jax.jit(lambda a, t, w, b: custom_model_forward(a, t, w, b, T))
    out_bf16 = jax.block_until_ready(fwd(anchor_hidden, target_hidden, wbf, bbf))
    assert out_bf16.shape == (B, T), out_bf16.shape
    assert jnp.allclose(out_bf16, ref, atol=2e-2, rtol=2e-2), (out_bf16, ref)

    # Padded-output path (skips the [:, :T] copy; consumer slices lazily).
    fwd_pad = jax.jit(lambda a, t, w, b: custom_model_forward(
        a, t, w, b, T, unpad=False))
    out_pad = jax.block_until_ready(fwd_pad(anchor_hidden, target_hidden, wbf, bbf))
    assert out_pad.shape[0] == B and out_pad.shape[1] % 128 == 0, out_pad.shape
    assert jnp.allclose(out_pad[:, :T], ref, atol=2e-2, rtol=2e-2)

    print("KERNEL_OK")
</pallas_src>

<mosaic_0001>
module attributes {stable_mosaic.version = 11 : i64} {
  func.func @_fc_cls_kernel(%arg0: i32, %arg1: memref<2x32xf32, #tpu.memory_space<vmem>>, %arg2: memref<2x32xf32, #tpu.memory_space<vmem>>, %arg3: memref<64x128xf32, #tpu.memory_space<vmem>>, %arg4: memref<1x128xf32, #tpu.memory_space<vmem>>, %arg5: memref<2x128xf32, #tpu.memory_space<vmem>>) attributes {dimension_semantics = [#tpu.dimension_semantics<parallel>], iteration_bounds = array<i64: 1>, scalar_prefetch = 0 : i64, scratch_operands = 0 : i64, tpu.core_type = #tpu.core_type<tc>, window_params = [{transform_indices = @transform_0, window_bounds = array<i64: 2, 32>}, {transform_indices = @transform_1, window_bounds = array<i64: 2, 32>}, {pipeline_mode = #tpu.pipeline_mode<synchronous>, transform_indices = @transform_2, window_bounds = array<i64: 64, 128>}, {pipeline_mode = #tpu.pipeline_mode<synchronous>, transform_indices = @transform_3, window_bounds = array<i64: 1, 128>}, {transform_indices = @transform_4, window_bounds = array<i64: 2, 128>}]} {
    %c0 = arith.constant 0 : index
    %c0_0 = arith.constant 0 : index
    %0 = vector.load %arg1[%c0, %c0_0] : memref<2x32xf32, #tpu.memory_space<vmem>>, vector<2x32xf32>
    %c0_1 = arith.constant 0 : index
    %c0_2 = arith.constant 0 : index
    %1 = vector.load %arg3[%c0_1, %c0_2] : memref<64x128xf32, #tpu.memory_space<vmem>>, vector<32x128xf32>
    %cst = arith.constant dense<0.000000e+00> : vector<2x128xf32>
    %2 = tpu.matmul %0, %1, %cst {dimension_numbers = #tpu.dot_dimension_numbers<[1], [0], [0], [1], [0, 0, 1, 1], [], []>} : vector<2x32xf32>, vector<32x128xf32>, vector<2x128xf32> -> vector<2x128xf32>
    %c0_3 = arith.constant 0 : index
    %c0_4 = arith.constant 0 : index
    %3 = vector.load %arg2[%c0_3, %c0_4] : memref<2x32xf32, #tpu.memory_space<vmem>>, vector<2x32xf32>
    %c32 = arith.constant 32 : index
    %c0_5 = arith.constant 0 : index
    %4 = vector.load %arg3[%c32, %c0_5] : memref<64x128xf32, #tpu.memory_space<vmem>>, vector<32x128xf32>
    %cst_6 = arith.constant dense<0.000000e+00> : vector<2x128xf32>
    %5 = tpu.matmul %3, %4, %cst_6 {dimension_numbers = #tpu.dot_dimension_numbers<[1], [0], [0], [1], [0, 0, 1, 1], [], []>} : vector<2x32xf32>, vector<32x128xf32>, vector<2x128xf32> -> vector<2x128xf32>
    %6 = arith.addf %2, %5 : vector<2x128xf32>
    %c0_7 = arith.constant 0 : index
    %c0_8 = arith.constant 0 : index
    %7 = vector.load %arg4[%c0_7, %c0_8] : memref<1x128xf32, #tpu.memory_space<vmem>>, vector<1x128xf32>
    %8 = vector.broadcast %7 : vector<1x128xf32> to vector<2x128xf32>
    %9 = arith.addf %6, %8 : vector<2x128xf32>
    %c0_9 = arith.constant 0 : index
    %c0_10 = arith.constant 0 : index
    %10 = vector.load %arg5[%c0_9, %c0_10] : memref<2x128xf32, #tpu.memory_space<vmem>>, vector<2x128xf32>
    tpu.vector_store %arg5[%c0_9, %c0_10], %9 {strides = array<i32>} : memref<2x128xf32, #tpu.memory_space<vmem>>, vector<2x128xf32>,
    return
  }
  func.func @transform_0(%arg0: i32) -> (i32, i32) {
    %c0_i32 = arith.constant 0 : i32
    %c0_i32_0 = arith.constant 0 : i32
    return %arg0, %c0_i32 : i32, i32
  }
  func.func @transform_1(%arg0: i32) -> (i32, i32) {
    %c0_i32 = arith.constant 0 : i32
    %c0_i32_0 = arith.constant 0 : i32
    return %arg0, %c0_i32 : i32, i32
  }
  func.func @transform_2(%arg0: i32) -> (i32, i32) {
    %c0_i32 = arith.constant 0 : i32
    %c0_i32_0 = arith.constant 0 : i32
    %c0_i32_1 = arith.constant 0 : i32
    return %c0_i32, %c0_i32_0 : i32, i32
  }
  func.func @transform_3(%arg0: i32) -> (i32, i32) {
    %c0_i32 = arith.constant 0 : i32
    %c0_i32_0 = arith.constant 0 : i32
    %c0_i32_1 = arith.constant 0 : i32
    return %c0_i32, %c0_i32_0 : i32, i32
  }
  func.func @transform_4(%arg0: i32) -> (i32, i32) {
    %c0_i32 = arith.constant 0 : i32
    %c0_i32_0 = arith.constant 0 : i32
    return %arg0, %c0_i32 : i32, i32
  }
}

</mosaic_0001>

<bundles_post_ra>
// kernel: _lambda_.1
= control target key start
LH: loop header
LB: loop body
LE: loop exit
PB: predicated region body
PF: predicated region fallthrough
CT: control target
= control target key end

     0   :  { %9 = vsyncpa [#allocation3], 0  ;;  %s133_s18 = smov [#allocation2]   ;;  %s134_s20 = smov 128   ;;  %s176_s0 = inlined_call_operand.vmem [shape: f32[2,32], index: 0, kind: input, shape index: {}]   ;;  %s177_s1 = inlined_call_operand.vmem [shape: f32[2,32], index: 1, kind: input, shape index: {}]   ;;  %s178_s2 = inlined_call_operand.hbm [shape: f32[64,128], index: 2, kind: input, shape index: {}]   ;;  %s179_s3 = inlined_call_operand.vmem [shape: f32[1,128], index: 3, kind: input, shape index: {}]   ;;  %s180_s4 = inlined_call_operand.vmem [shape: f32[2,128], index: 4, kind: output, shape index: {}]  }
   0x1   :  { %s18_s17 = sshll.u32 %s178_s2, 4  ;;  %s20_s19 = sshll.u32 %s133_s18, 4  ;;  %s19_s17 = int_to_ptr.hbm [resolvable:$true] %s18_s17  ;;  %s21_s19 = int_to_ptr.vmem [resolvable:$true] %s20_s19 }
   0x2   :  { %s135_s21 = smov 8  }
   0x3   :  { %26 = dma.hbm_to_vmem [thread:$0]  %s19_s17, 1024, %s21_s19, [#allocation3], %s134_s20, %s134_s20, %s135_s21  }
   0x4   :  { %131 = dma.done.wait [#allocation3], 1024  }
   0x5   :  { %132 = vsyncadd [#allocation3], 4294966272  ;;  %v42_v0 = vld [vmem:[#allocation2 + $0x38] sm:$0xff]  ;;  %v41_v2 = vld [vmem:[#allocation2 + $0x30] sm:$0xff]  ;;  %vm43_vm0 = vcmask 261120  }
   0x6   :  { %v37_v1 = vld [vmem:[#allocation2 + $0x18] sm:$0xff]  ;;  %59 = vmatpush.msra.mxu0 %v42_v0  ;;  %v36_v3 = vld [vmem:[#allocation2 + $0x10] sm:$0xff]  ;;  %v40_v4 = vld [vmem:[#allocation2 + $0x28] sm:$0xff] }
   0x7   :  { %82 = vmatpush.msra.mxu1 %v37_v1  ;;  %v35_v5 = vld [vmem:[#allocation2 + $0x8] sm:$0xff]  ;;  %v39_v6 = vld [vmem:[#allocation2 + $0x20] sm:$0xff] }
   0x8   :  { %60 = vmatpush.msra.mxu0 %v41_v2  ;;  %v34_v7 = vld [vmem:[#allocation2] sm:$0xff] }
   0x9   :  { %83 = vmatpush.msra.mxu1 %v36_v3  ;;  %v38_v8 = vld [vmem:[%s177_s1] sm:$0x3] }
   0xa   :  { %61 = vmatpush.msra.mxu0 %v40_v4  ;;  %v33_v9 = vld [vmem:[%s176_s0] sm:$0x3] }
   0xb   :  { %84 = vmatpush.msra.mxu1 %v35_v5  ;;  %v106_v10 = vld [vmem:[%s179_s3] ss:$0 sm:$0xff] }
   0xc   :  { %62 = vmatpush.msra.mxu0 %v39_v6 }
   0xd   :  { %85 = vmatpush.msra.mxu1 %v34_v7  ;;  %101 = vmatmul.msk.f32.vlgmr.msra.gmra.mxu0 %vm43_vm0, %v38_v8 }
   0xe   :  { %102 = vmatmul.msk.f32.vlgmr.msra.gmra.mxu1 %vm43_vm0, %v33_v9 }
  0x8a   :  { %v64_v11 = vpop.f32.mrf.mxu0 }
  0x8b   :  { %v87_v12 = vpop.f32.mrf.mxu1 }
  0x8c   :  { %v88_v13 = vadd.f32 %v87_v12, %v64_v11 }
  0x8e   :  { %v94_v14 = vadd.f32 %v106_v10, %v88_v13 }
  0x90   :  { %95 = vst [vmem:[%s180_s4] sm:$0x3] %v94_v14 }
  0x91   :  { %100 = vsyncpa [#allocation3], 1 }

</bundles_post_ra>
